<compile_context>
chip_gen: v7x
topology: tpu7x:2x2x1
jax: 0.10.0
libtpu: 0.0.40
codegen_flags: <defaults>
</compile_context>

<pallas_src>
import math
import jax
import jax.numpy as jnp
from jax.experimental import pallas as pl
from jax.experimental.pallas import tpu as pltpu

_INV_SQRT2 = 1.0 / math.sqrt(2.0)


def _gelu_exact(x):
    # Matches torch.nn.GELU() default (erf-based, not tanh approximation).
    return 0.5 * x * (1.0 + jax.lax.erf(x * _INV_SQRT2))


def trans_video_kernel(x_ref,
                       w1_ref, b1_ref, w2_ref, b2_ref,
                       w3_ref, b3_ref, w4_ref, b4_ref,
                       ablk_ref,
                       out_ref):
    G, T, IN = x_ref.shape
    OUT = out_ref.shape[-1]

    # Fold G batch elements into the matmul M dimension (leading-dim-only reshape, no relayout).
    x = x_ref[...].reshape(G * T, IN)                                            # bf16

    h = jnp.dot(x, w1_ref[...], preferred_element_type=jnp.float32) + b1_ref[...]
    h = _gelu_exact(h).astype(jnp.bfloat16)
    h = jnp.dot(h, w2_ref[...], preferred_element_type=jnp.float32) + b2_ref[...]
    h = _gelu_exact(h).astype(jnp.bfloat16)
    h = jnp.dot(h, w3_ref[...], preferred_element_type=jnp.float32) + b3_ref[...]
    h = _gelu_exact(h).astype(jnp.bfloat16)
    y = jnp.dot(h, w4_ref[...], preferred_element_type=jnp.float32) + b4_ref[...]  # f32 (G*T, OUT)

    # All four local-window means for all G batch elements in a single f32 matmul
    # with the block-diagonal averaging matrix (G*4*T, G*T).
    lw = jnp.dot(ablk_ref[...], y, preferred_element_type=jnp.float32)             # (G*4*T, OUT)

    # Packed, lane-dense output: channel 0 = y, channels 1..4 = local windows 1,2,4,8.
    out_ref[:, 0:1, :, :] = y.reshape(G, 1, T, OUT)
    out_ref[:, 1:5, :, :] = lw.reshape(G, 4, T, OUT)


def make_window_matrix(T, dtype=jnp.float32):
    """Fused (4*T, T) averaging matrix.

    Row w_idx*T + i holds 1/cnt over columns [max(i-w,0), min(i+w,T)) for w in (1,2,4,8),
    exactly matching the PyTorch slice-mean semantics (exclusive i+w upper bound).
    """
    rows = []
    for w in (1, 2, 4, 8):
        for i in range(T):
            lo, hi = max(i - w, 0), min(i + w, T)
            cnt = hi - lo
            row = [0.0] * T
            for t in range(lo, hi):
                row[t] = 1.0 / cnt
            rows.append(row)
    return jnp.asarray(rows, dtype=dtype)  # (4*T, T)


def _pick_batch_per_step(B, T, target_rows=256, max_rows=1024):
    """Largest divisor G of B with G*T <= max_rows, stopping once G*T >= target_rows."""
    best = 1
    for g in range(1, B + 1):
        if B % g == 0 and g * T <= max_rows:
            best = g
            if g * T >= target_rows:
                break
    return best


def trans_video_feature(x, params, *, batch_per_step=None):
    B, T, IN = x.shape
    H = params["w1"].shape[1]
    OUT = params["w4"].shape[1]

    G = batch_per_step or _pick_batch_per_step(B, T)
    assert B % G == 0, "batch_per_step must divide the batch size"
    # TODO(synk): on v7x (2 TensorCores/chip) keep >= 2 parallel grid steps once B*T is large.

    A = make_window_matrix(T)                                # (4T, T) f32
    A_blk = jnp.kron(jnp.eye(G, dtype=A.dtype), A)           # (G*4T, G*T) block-diagonal

    # bf16 MXU inputs (weights + activations); biases and accumulation stay f32.
    xb = x.astype(jnp.bfloat16)
    wb = {k: params[k].astype(jnp.bfloat16) for k in ("w1", "w2", "w3", "w4")}

    def full_spec(shape):
        n = len(shape)
        return pl.BlockSpec(shape, lambda b, n=n: (0,) * n)

    out = pl.pallas_call(
        trans_video_kernel,
        out_shape=jax.ShapeDtypeStruct((B, 5, T, OUT), jnp.float32),
        grid=(B // G,),
        in_specs=[
            pl.BlockSpec((G, T, IN), lambda b: (b, 0, 0)),   # x: G batch elements per step
            full_spec((IN, H)), full_spec((1, H)),           # fc1
            full_spec((H, H)), full_spec((1, H)),            # fc2
            full_spec((H, OUT)), full_spec((1, OUT)),        # fc3
            full_spec((OUT, OUT)), full_spec((1, OUT)),      # fc4
            full_spec((G * 4 * T, G * T)),                   # fused block-diag window matrix
        ],
        out_specs=pl.BlockSpec((G, 5, T, OUT), lambda b: (b, 0, 0, 0)),
        compiler_params=pltpu.CompilerParams(dimension_semantics=("parallel",)),
    )(xb,
      wb["w1"], params["b1"], wb["w2"], params["b2"],
      wb["w3"], params["b3"], wb["w4"], params["b4"],
      A_blk)

    return out[:, 0], out[:, 1], out[:, 2], out[:, 3], out[:, 4]


def reference(x, params):
    """Pure-f32 JAX reference mirroring the PyTorch forward exactly."""
    h = jax.nn.gelu(x @ params["w1"] + params["b1"], approximate=False)
    h = jax.nn.gelu(h @ params["w2"] + params["b2"], approximate=False)
    h = jax.nn.gelu(h @ params["w3"] + params["b3"], approximate=False)
    y = h @ params["w4"] + params["b4"]
    T = y.shape[1]

    def window(w):
        cols = []
        for i in range(T):
            lo, hi = max(i - w, 0), min(i + w, T)
            cols.append(y[:, lo:hi, :].mean(axis=1, keepdims=True))
        return jnp.concatenate(cols, axis=1)

    return (y, window(1), window(2), window(4), window(8))


def init_params(key, input_size, hidden_size, output_size):
    # Weights stored as (in, out) so the kernel computes x @ W + b
    # (equivalent to PyTorch's x @ weight.T + bias).
    dims = [(input_size, hidden_size),
            (hidden_size, hidden_size),
            (hidden_size, output_size),
            (output_size, output_size)]
    params = {}
    keys = jax.random.split(key, 2 * len(dims))
    for idx, (fan_in, fan_out) in enumerate(dims):
        bound = 1.0 / math.sqrt(fan_in)
        w = jax.random.uniform(keys[2 * idx], (fan_in, fan_out),
                               minval=-bound, maxval=bound, dtype=jnp.float32)
        b = jax.random.uniform(keys[2 * idx + 1], (1, fan_out),
                               minval=-bound, maxval=bound, dtype=jnp.float32)
        params[f"w{idx + 1}"] = w
        params[f"b{idx + 1}"] = b
    return params


if __name__ == "__main__":
    # Small shapes, but with 128-wide features so all last dims are lane-dense
    # (the real module defaults are 512/256/128).
    B, T = 2, 16
    INPUT_SIZE, HIDDEN_SIZE, OUTPUT_SIZE = 128, 128, 128

    key = jax.random.PRNGKey(0)
    k_x, k_p = jax.random.split(key)
    x = jax.random.normal(k_x, (B, T, INPUT_SIZE), dtype=jnp.float32)
    params = init_params(k_p, INPUT_SIZE, HIDDEN_SIZE, OUTPUT_SIZE)

    outs = trans_video_feature(x, params)
    outs = jax.block_until_ready(outs)

    refs = reference(x, params)
    for o, r in zip(outs, refs):
        assert o.shape == r.shape and o.dtype == jnp.float32
        # bf16 MXU inputs with f32 accumulation vs. pure-f32 reference -> loosened tolerance.
        assert jnp.allclose(o, r, rtol=3e-2, atol=3e-2), "mismatch vs JAX reference"

    print("KERNEL_OK")
</pallas_src>

<mosaic_0001>
module attributes {stable_mosaic.version = 11 : i64} {
  func.func @trans_video_kernel(%arg0: i32, %arg1: memref<2x16x128xbf16, #tpu.memory_space<vmem>>, %arg2: memref<128x128xbf16, #tpu.memory_space<vmem>>, %arg3: memref<1x128xf32, #tpu.memory_space<vmem>>, %arg4: memref<128x128xbf16, #tpu.memory_space<vmem>>, %arg5: memref<1x128xf32, #tpu.memory_space<vmem>>, %arg6: memref<128x128xbf16, #tpu.memory_space<vmem>>, %arg7: memref<1x128xf32, #tpu.memory_space<vmem>>, %arg8: memref<128x128xbf16, #tpu.memory_space<vmem>>, %arg9: memref<1x128xf32, #tpu.memory_space<vmem>>, %arg10: memref<128x32xf32, #tpu.memory_space<vmem>>, %arg11: memref<2x5x16x128xf32, #tpu.memory_space<vmem>>) attributes {dimension_semantics = [#tpu.dimension_semantics<parallel>], iteration_bounds = array<i64: 1>, scalar_prefetch = 0 : i64, scratch_operands = 0 : i64, tpu.core_type = #tpu.core_type<tc>, window_params = [{transform_indices = @transform_0, window_bounds = array<i64: 2, 16, 128>}, {pipeline_mode = #tpu.pipeline_mode<synchronous>, transform_indices = @transform_1, window_bounds = array<i64: 128, 128>}, {pipeline_mode = #tpu.pipeline_mode<synchronous>, transform_indices = @transform_2, window_bounds = array<i64: 1, 128>}, {pipeline_mode = #tpu.pipeline_mode<synchronous>, transform_indices = @transform_3, window_bounds = array<i64: 128, 128>}, {pipeline_mode = #tpu.pipeline_mode<synchronous>, transform_indices = @transform_4, window_bounds = array<i64: 1, 128>}, {pipeline_mode = #tpu.pipeline_mode<synchronous>, transform_indices = @transform_5, window_bounds = array<i64: 128, 128>}, {pipeline_mode = #tpu.pipeline_mode<synchronous>, transform_indices = @transform_6, window_bounds = array<i64: 1, 128>}, {pipeline_mode = #tpu.pipeline_mode<synchronous>, transform_indices = @transform_7, window_bounds = array<i64: 128, 128>}, {pipeline_mode = #tpu.pipeline_mode<synchronous>, transform_indices = @transform_8, window_bounds = array<i64: 1, 128>}, {pipeline_mode = #tpu.pipeline_mode<synchronous>, transform_indices = @transform_9, window_bounds = array<i64: 128, 32>}, {transform_indices = @transform_10, window_bounds = array<i64: 2, 5, 16, 128>}]} {
    %c0 = arith.constant 0 : index
    %c0_0 = arith.constant 0 : index
    %c0_1 = arith.constant 0 : index
    %0 = vector.load %arg1[%c0, %c0_0, %c0_1] : memref<2x16x128xbf16, #tpu.memory_space<vmem>>, vector<2x16x128xbf16>
    %1 = vector.shape_cast %0 : vector<2x16x128xbf16> to vector<32x128xbf16>
    %c0_2 = arith.constant 0 : index
    %c0_3 = arith.constant 0 : index
    %2 = vector.load %arg2[%c0_2, %c0_3] : memref<128x128xbf16, #tpu.memory_space<vmem>>, vector<128x128xbf16>
    %cst = arith.constant dense<0.000000e+00> : vector<32x128xf32>
    %3 = tpu.matmul %1, %2, %cst {dimension_numbers = #tpu.dot_dimension_numbers<[1], [0], [0], [1], [0, 0, 1, 1], [], []>} : vector<32x128xbf16>, vector<128x128xbf16>, vector<32x128xf32> -> vector<32x128xf32>
    %c0_4 = arith.constant 0 : index
    %c0_5 = arith.constant 0 : index
    %4 = vector.load %arg3[%c0_4, %c0_5] : memref<1x128xf32, #tpu.memory_space<vmem>>, vector<1x128xf32>
    %5 = vector.broadcast %4 : vector<1x128xf32> to vector<32x128xf32>
    %6 = arith.addf %3, %5 : vector<32x128xf32>
    %cst_6 = arith.constant 5.000000e-01 : f32
    %7 = vector.broadcast %cst_6 : f32 to vector<32x128xf32>
    %8 = arith.mulf %7, %6 : vector<32x128xf32>
    %cst_7 = arith.constant 0.707106769 : f32
    %9 = vector.broadcast %cst_7 : f32 to vector<32x128xf32>
    %10 = arith.mulf %6, %9 : vector<32x128xf32>
    %11 = math.erf %10 : vector<32x128xf32>
    %cst_8 = arith.constant 1.000000e+00 : f32
    %12 = vector.broadcast %cst_8 : f32 to vector<32x128xf32>
    %13 = arith.addf %12, %11 : vector<32x128xf32>
    %14 = arith.mulf %8, %13 : vector<32x128xf32>
    %15 = arith.truncf %14 : vector<32x128xf32> to vector<32x128xbf16>
    %c0_9 = arith.constant 0 : index
    %c0_10 = arith.constant 0 : index
    %16 = vector.load %arg4[%c0_9, %c0_10] : memref<128x128xbf16, #tpu.memory_space<vmem>>, vector<128x128xbf16>
    %cst_11 = arith.constant dense<0.000000e+00> : vector<32x128xf32>
    %17 = tpu.matmul %15, %16, %cst_11 {dimension_numbers = #tpu.dot_dimension_numbers<[1], [0], [0], [1], [0, 0, 1, 1], [], []>} : vector<32x128xbf16>, vector<128x128xbf16>, vector<32x128xf32> -> vector<32x128xf32>
    %c0_12 = arith.constant 0 : index
    %c0_13 = arith.constant 0 : index
    %18 = vector.load %arg5[%c0_12, %c0_13] : memref<1x128xf32, #tpu.memory_space<vmem>>, vector<1x128xf32>
    %19 = vector.broadcast %18 : vector<1x128xf32> to vector<32x128xf32>
    %20 = arith.addf %17, %19 : vector<32x128xf32>
    %cst_14 = arith.constant 5.000000e-01 : f32
    %21 = vector.broadcast %cst_14 : f32 to vector<32x128xf32>
    %22 = arith.mulf %21, %20 : vector<32x128xf32>
    %cst_15 = arith.constant 0.707106769 : f32
    %23 = vector.broadcast %cst_15 : f32 to vector<32x128xf32>
    %24 = arith.mulf %20, %23 : vector<32x128xf32>
    %25 = math.erf %24 : vector<32x128xf32>
    %cst_16 = arith.constant 1.000000e+00 : f32
    %26 = vector.broadcast %cst_16 : f32 to vector<32x128xf32>
    %27 = arith.addf %26, %25 : vector<32x128xf32>
    %28 = arith.mulf %22, %27 : vector<32x128xf32>
    %29 = arith.truncf %28 : vector<32x128xf32> to vector<32x128xbf16>
    %c0_17 = arith.constant 0 : index
    %c0_18 = arith.constant 0 : index
    %30 = vector.load %arg6[%c0_17, %c0_18] : memref<128x128xbf16, #tpu.memory_space<vmem>>, vector<128x128xbf16>
    %cst_19 = arith.constant dense<0.000000e+00> : vector<32x128xf32>
    %31 = tpu.matmul %29, %30, %cst_19 {dimension_numbers = #tpu.dot_dimension_numbers<[1], [0], [0], [1], [0, 0, 1, 1], [], []>} : vector<32x128xbf16>, vector<128x128xbf16>, vector<32x128xf32> -> vector<32x128xf32>
    %c0_20 = arith.constant 0 : index
    %c0_21 = arith.constant 0 : index
    %32 = vector.load %arg7[%c0_20, %c0_21] : memref<1x128xf32, #tpu.memory_space<vmem>>, vector<1x128xf32>
    %33 = vector.broadcast %32 : vector<1x128xf32> to vector<32x128xf32>
    %34 = arith.addf %31, %33 : vector<32x128xf32>
    %cst_22 = arith.constant 5.000000e-01 : f32
    %35 = vector.broadcast %cst_22 : f32 to vector<32x128xf32>
    %36 = arith.mulf %35, %34 : vector<32x128xf32>
    %cst_23 = arith.constant 0.707106769 : f32
    %37 = vector.broadcast %cst_23 : f32 to vector<32x128xf32>
    %38 = arith.mulf %34, %37 : vector<32x128xf32>
    %39 = math.erf %38 : vector<32x128xf32>
    %cst_24 = arith.constant 1.000000e+00 : f32
    %40 = vector.broadcast %cst_24 : f32 to vector<32x128xf32>
    %41 = arith.addf %40, %39 : vector<32x128xf32>
    %42 = arith.mulf %36, %41 : vector<32x128xf32>
    %43 = arith.truncf %42 : vector<32x128xf32> to vector<32x128xbf16>
    %c0_25 = arith.constant 0 : index
    %c0_26 = arith.constant 0 : index
    %44 = vector.load %arg8[%c0_25, %c0_26] : memref<128x128xbf16, #tpu.memory_space<vmem>>, vector<128x128xbf16>
    %cst_27 = arith.constant dense<0.000000e+00> : vector<32x128xf32>
    %45 = tpu.matmul %43, %44, %cst_27 {dimension_numbers = #tpu.dot_dimension_numbers<[1], [0], [0], [1], [0, 0, 1, 1], [], []>} : vector<32x128xbf16>, vector<128x128xbf16>, vector<32x128xf32> -> vector<32x128xf32>
    %c0_28 = arith.constant 0 : index
    %c0_29 = arith.constant 0 : index
    %46 = vector.load %arg9[%c0_28, %c0_29] : memref<1x128xf32, #tpu.memory_space<vmem>>, vector<1x128xf32>
    %47 = vector.broadcast %46 : vector<1x128xf32> to vector<32x128xf32>
    %48 = arith.addf %45, %47 : vector<32x128xf32>
    %c0_30 = arith.constant 0 : index
    %c0_31 = arith.constant 0 : index
    %49 = vector.load %arg10[%c0_30, %c0_31] : memref<128x32xf32, #tpu.memory_space<vmem>>, vector<128x32xf32>
    %cst_32 = arith.constant dense<0.000000e+00> : vector<128x128xf32>
    %50 = tpu.matmul %49, %48, %cst_32 {dimension_numbers = #tpu.dot_dimension_numbers<[1], [0], [0], [1], [0, 0, 1, 1], [], []>} : vector<128x32xf32>, vector<32x128xf32>, vector<128x128xf32> -> vector<128x128xf32>
    %51 = vector.shape_cast %48 : vector<32x128xf32> to vector<2x1x16x128xf32>
    %c0_33 = arith.constant 0 : index
    %c0_34 = arith.constant 0 : index
    %c0_35 = arith.constant 0 : index
    %c0_36 = arith.constant 0 : index
    %52 = vector.load %arg11[%c0_33, %c0_34, %c0_35, %c0_36] : memref<2x5x16x128xf32, #tpu.memory_space<vmem>>, vector<2x1x16x128xf32>
    tpu.vector_store %arg11[%c0_33, %c0_34, %c0_35, %c0_36], %51 {strides = array<i32>} : memref<2x5x16x128xf32, #tpu.memory_space<vmem>>, vector<2x1x16x128xf32>,
    %53 = vector.shape_cast %50 : vector<128x128xf32> to vector<2x4x16x128xf32>
    %c0_37 = arith.constant 0 : index
    %c1 = arith.constant 1 : index
    %c0_38 = arith.constant 0 : index
    %c0_39 = arith.constant 0 : index
    %54 = vector.load %arg11[%c0_37, %c1, %c0_38, %c0_39] : memref<2x5x16x128xf32, #tpu.memory_space<vmem>>, vector<2x4x16x128xf32>
    tpu.vector_store %arg11[%c0_37, %c1, %c0_38, %c0_39], %53 {strides = array<i32>} : memref<2x5x16x128xf32, #tpu.memory_space<vmem>>, vector<2x4x16x128xf32>,
    return
  }
  func.func @transform_0(%arg0: i32) -> (i32, i32, i32) {
    %c0_i32 = arith.constant 0 : i32
    %c0_i32_0 = arith.constant 0 : i32
    %c0_i32_1 = arith.constant 0 : i32
    return %arg0, %c0_i32, %c0_i32_0 : i32, i32, i32
  }
  func.func @transform_1(%arg0: i32) -> (i32, i32) {
    %c0_i32 = arith.constant 0 : i32
    %c0_i32_0 = arith.constant 0 : i32
    %c0_i32_1 = arith.constant 0 : i32
    return %c0_i32, %c0_i32_0 : i32, i32
  }
  func.func @transform_2(%arg0: i32) -> (i32, i32) {
    %c0_i32 = arith.constant 0 : i32
    %c0_i32_0 = arith.constant 0 : i32
    %c0_i32_1 = arith.constant 0 : i32
    return %c0_i32, %c0_i32_0 : i32, i32
  }
  func.func @transform_3(%arg0: i32) -> (i32, i32) {
    %c0_i32 = arith.constant 0 : i32
    %c0_i32_0 = arith.constant 0 : i32
    %c0_i32_1 = arith.constant 0 : i32
    return %c0_i32, %c0_i32_0 : i32, i32
  }
  func.func @transform_4(%arg0: i32) -> (i32, i32) {
    %c0_i32 = arith.constant 0 : i32
    %c0_i32_0 = arith.constant 0 : i32
    %c0_i32_1 = arith.constant 0 : i32
    return %c0_i32, %c0_i32_0 : i32, i32
  }
  func.func @transform_5(%arg0: i32) -> (i32, i32) {
    %c0_i32 = arith.constant 0 : i32
    %c0_i32_0 = arith.constant 0 : i32
    %c0_i32_1 = arith.constant 0 : i32
    return %c0_i32, %c0_i32_0 : i32, i32
  }
  func.func @transform_6(%arg0: i32) -> (i32, i32) {
    %c0_i32 = arith.constant 0 : i32
    %c0_i32_0 = arith.constant 0 : i32
    %c0_i32_1 = arith.constant 0 : i32
    return %c0_i32, %c0_i32_0 : i32, i32
  }
  func.func @transform_7(%arg0: i32) -> (i32, i32) {
    %c0_i32 = arith.constant 0 : i32
    %c0_i32_0 = arith.constant 0 : i32
    %c0_i32_1 = arith.constant 0 : i32
    return %c0_i32, %c0_i32_0 : i32, i32
  }
  func.func @transform_8(%arg0: i32) -> (i32, i32) {
    %c0_i32 = arith.constant 0 : i32
    %c0_i32_0 = arith.constant 0 : i32
    %c0_i32_1 = arith.constant 0 : i32
    return %c0_i32, %c0_i32_0 : i32, i32
  }
  func.func @transform_9(%arg0: i32) -> (i32, i32) {
    %c0_i32 = arith.constant 0 : i32
    %c0_i32_0 = arith.constant 0 : i32
    %c0_i32_1 = arith.constant 0 : i32
    return %c0_i32, %c0_i32_0 : i32, i32
  }
  func.func @transform_10(%arg0: i32) -> (i32, i32, i32, i32) {
    %c0_i32 = arith.constant 0 : i32
    %c0_i32_0 = arith.constant 0 : i32
    %c0_i32_1 = arith.constant 0 : i32
    %c0_i32_2 = arith.constant 0 : i32
    return %arg0, %c0_i32, %c0_i32_0, %c0_i32_1 : i32, i32, i32, i32
  }
}

</mosaic_0001>

<bundles_post_ra>
// kernel: tpu_custom_call.1
= control target key start
LH: loop header
LB: loop body
LE: loop exit
PB: predicated region body
PF: predicated region fallthrough
CT: control target
= control target key end

     0   :  { %15 = vsyncpa [#allocation3], 0  ;;  %s1479_s0 = inlined_call_operand.vmem [shape: bf16[2,16,128], index: 0, kind: input, shape index: {}]   ;;  %s1480_s1 = inlined_call_operand.vmem [shape: bf16[128,128], index: 1, kind: input, shape index: {}]   ;;  %s1481_s2 = inlined_call_operand.vmem [shape: f32[1,128], index: 2, kind: input, shape index: {}]   ;;  %s1482_s3 = inlined_call_operand.vmem [shape: bf16[128,128], index: 3, kind: input, shape index: {}]   ;;  %s1483_s4 = inlined_call_operand.vmem [shape: f32[1,128], index: 4, kind: input, shape index: {}]   ;;  %s1484_s5 = inlined_call_operand.hbm [shape: bf16[128,128], index: 5, kind: input, shape index: {}]   ;;  %s1485_s6 = inlined_call_operand.vmem [shape: f32[1,128], index: 6, kind: input, shape index: {}]   ;;  %s1486_s7 = inlined_call_operand.hbm [shape: bf16[128,128], index: 7, kind: input, shape index: {}]   ;;  %s1487_s8 = inlined_call_operand.vmem [shape: f32[1,128], index: 8, kind: input, shape index: {}]   ;;  %s1488_s9 = inlined_call_operand.vmem [shape: f32[128,32], index: 9, kind: input, shape index: {}]   ;;  %s1489_s10 = inlined_call_operand.hbm [shape: f32[2,5,16,128], index: 10, kind: output, shape index: {}]  }
   0x1   :  { %16 = vsyncpa [#allocation6], 0 }
   0x2   :  { %17 = vsyncpa [#allocation4], 0  ;;  %s1251_s13 = smov [#allocation2]   ;;  %s1179_s17 = scalar_lea.hbm %s1484_s5, 1024 }
   0x3   :  { %s33_s14 = sshll.u32 %s1251_s13, 4  ;;  %p1180_p0 = scmp.ne.s32.totalorder %s1484_s5, %s1179_s17  ;;  %s34_s14 = int_to_ptr.vmem [resolvable:$true] %s33_s14 }
   0x4   :  { %p1183_p1 = scmp.lt.u32.totalorder %s1179_s17, %s1484_s5 }
   0x6   :  { %p1185_p2 = pnand %p1183_p1, %p1180_p0 }
   0x8   :  { %1188 = shalt.err (!%p1185_p2)
}
   0x9   :  { %s1189_s22 = scalar_lea.vmem %s34_s14, 1024  ;;  %p1194_p4 = scmp.lt.s32.totalorder %s34_s14, %s34_s14 }
   0xa   :  { %p1190_p3 = scmp.ne.s32.totalorder %s34_s14, %s1189_s22  ;;  %p1195_p5 = scmp.lt.s32.totalorder %s1189_s22, %s1189_s22 }
   0xc   :  { %p1196_p6 = por %p1195_p5, %p1194_p4 }
   0xe   :  { %p1197_p7 = pnand %p1196_p6, %p1190_p3 }
  0x10   :  { %1200 = shalt.err (!%p1197_p7)
}
  0x11   :  { %s1252_s23 = smov 64   ;;  %s1253_s24 = smov 4  }
  0x12   :  { %39 = dma.hbm_to_vmem [thread:$0]  %s1484_s5, 1024, %s34_s14, [#allocation3], %s1252_s23, %s1252_s23, %s1253_s24  }
  0x13   :  { %s1254_s27 = smov [#allocation5]   ;;  %s1201_s11 = scalar_lea.hbm %s1486_s7, 1024 }
  0x14   :  { %s47_s28 = sshll.u32 %s1254_s27, 4  ;;  %p1202_p8 = scmp.ne.s32.totalorder %s1486_s7, %s1201_s11  ;;  %s48_s28 = int_to_ptr.vmem [resolvable:$true] %s47_s28 }
  0x15   :  { %p1205_p9 = scmp.lt.u32.totalorder %s1201_s11, %s1486_s7 }
  0x17   :  { %p1207_p10 = pnand %p1205_p9, %p1202_p8 }
  0x19   :  { %1210 = shalt.err (!%p1207_p10)
}
  0x1a   :  { %s1211_s17 = scalar_lea.vmem %s48_s28, 1024  ;;  %p1216_p12 = scmp.lt.s32.totalorder %s48_s28, %s48_s28 }
  0x1b   :  { %p1212_p11 = scmp.ne.s32.totalorder %s48_s28, %s1211_s17  ;;  %p1217_p13 = scmp.lt.s32.totalorder %s1211_s17, %s1211_s17 }
  0x1d   :  { %p1218_p0 = por %p1217_p13, %p1216_p12 }
  0x1f   :  { %p1219_p1 = pnand %p1218_p0, %p1212_p11 }
  0x21   :  { %1222 = shalt.err (!%p1219_p1)
}
  0x22   :  { %53 = dma.hbm_to_vmem [thread:$0]  %s1486_s7, 1024, %s48_s28, [#allocation6], %s1252_s23, %s1252_s23, %s1253_s24  }
  0x23   :  { %1245 = dma.done.wait [#allocation3], 1024  }
  0x24   :  { %1246 = vsyncadd [#allocation3], 4294966272 }
  0x25   :  { %1247 = dma.done.wait [#allocation6], 1024  }
  0x26   :  { %1248 = vsyncadd [#allocation6], 4294966272  ;;  %v1121_v0 = vld [vmem:[%s1480_s1] sm:$0xff]   ;;  %v1122_v1 = vld [vmem:[%s1480_s1 + $0x8] sm:$0xff]   ;;  %vm643_vm0 = vcmask 261120  }
  0x27   :  { %990 = vmatprep.subr.bf16.mxu0 %v1121_v0  ;;  %v1123_v2 = vld [vmem:[%s1480_s1 + $0x10] sm:$0xff]   ;;  %v1124_v3 = vld [vmem:[%s1480_s1 + $0x18] sm:$0xff]   ;;  %v1129_v4 = vld [vmem:[%s1479_s0] sm:$0xff]  }
  0x28   :  { %991 = vmatpush3.bf16.msra.mxu0 %v1121_v0  ;;  %v1125_v5 = vld [vmem:[%s1480_s1 + $0x20] sm:$0xff]   ;;  %1006 = vmatprep.mubr.bf16.mxu0 %v1129_v4  ;;  %v1132_v7 = vld [vmem:[%s1482_s3 + $0x8] sm:$0xff]   ;;  %v1127_v9 = vld [vmem:[%s1480_s1 + $0x30] sm:$0xff]  }
  0x29   :  { %992 = vmatprep.subr.bf16.mxu0 %v1122_v1  ;;  %v1131_v6 = vld [vmem:[%s1482_s3] sm:$0xff]   ;;  %v1126_v8 = vld [vmem:[%s1480_s1 + $0x28] sm:$0xff]   ;;  %v1128_v10 = vld [vmem:[%s1480_s1 + $0x38] sm:$0xff]  }
  0x2a   :  { %1010 = vmatprep.subr.bf16.mxu1 %v1131_v6  ;;  %v1130_v11 = vld [vmem:[%s1479_s0 + $0x8] sm:$0xff]   ;;  %v1133_v12 = vld [vmem:[%s1482_s3 + $0x10] sm:$0xff]   ;;  %v1134_v13 = vld [vmem:[%s1482_s3 + $0x18] sm:$0xff]  }
  0x2b   :  { %1011 = vmatpush3.bf16.msra.mxu1 %v1131_v6  ;;  %v1135_v14 = vld [vmem:[%s1482_s3 + $0x20] sm:$0xff]   ;;  %v1136_v15 = vld [vmem:[%s1482_s3 + $0x28] sm:$0xff]   ;;  %v1137_v16 = vld [vmem:[%s1482_s3 + $0x30] sm:$0xff]  }
  0x2c   :  { %993 = vmatpush3.bf16.msra.mxu0 %v1122_v1  ;;  %1012 = vmatprep.subr.bf16.mxu1 %v1132_v7  ;;  %v1138_v17 = vld [vmem:[%s1482_s3 + $0x38] sm:$0xff]   ;;  %v1139_v18 = vld [vmem:[#allocation2] sm:$0xff]   ;;  %v1140_v19 = vld [vmem:[#allocation2 + $0x8] sm:$0xff]  }
  0x2d   :  { %994 = vmatprep.subr.bf16.mxu0 %v1123_v2  ;;  %v876_v20 = vld [vmem:[%s1481_s2] ss:$0 sm:$0xff]  ;;  %v1141_v51 = vld [vmem:[#allocation2 + $0x10] sm:$0xff]   ;;  %v1142_v52 = vld [vmem:[#allocation2 + $0x18] sm:$0xff]  }
  0x2e   :  { %v1143_v53 = vld [vmem:[#allocation2 + $0x20] sm:$0xff]   ;;  %v1144_v54 = vld [vmem:[#allocation2 + $0x28] sm:$0xff]   ;;  %v1145_v55 = vld [vmem:[#allocation2 + $0x30] sm:$0xff]  }
  0x2f   :  { %1013 = vmatpush3.bf16.msra.mxu1 %v1132_v7  ;;  %v1146_v56 = vld [vmem:[#allocation2 + $0x38] sm:$0xff]   ;;  %v1147_v57 = vld [vmem:[#allocation5] sm:$0xff]   ;;  %v1148_v58 = vld [vmem:[#allocation5 + $0x8] sm:$0xff]  }
  0x30   :  { %995 = vmatpush3.bf16.msra.mxu0 %v1123_v2  ;;  %1014 = vmatprep.subr.bf16.mxu1 %v1133_v12  ;;  %v887_v59 = vld [vmem:[%s1483_s4] ss:$0 sm:$0xff] }
  0x31   :  { %996 = vmatprep.subr.bf16.mxu0 %v1124_v3 }
  0x33   :  { %1015 = vmatpush3.bf16.msra.mxu1 %v1133_v12 }
  0x34   :  { %997 = vmatpush3.bf16.msra.mxu0 %v1124_v3  ;;  %1016 = vmatprep.subr.bf16.mxu1 %v1134_v13 }
  0x35   :  { %998 = vmatprep.subr.bf16.mxu0 %v1125_v5 }
  0x37   :  { %1017 = vmatpush3.bf16.msra.mxu1 %v1134_v13 }
  0x38   :  { %999 = vmatpush3.bf16.msra.mxu0 %v1125_v5  ;;  %1018 = vmatprep.subr.bf16.mxu1 %v1135_v14 }
  0x39   :  { %1000 = vmatprep.subr.bf16.mxu0 %v1126_v8 }
  0x3b   :  { %1019 = vmatpush3.bf16.msra.mxu1 %v1135_v14 }
  0x3c   :  { %1001 = vmatpush3.bf16.msra.mxu0 %v1126_v8  ;;  %1020 = vmatprep.subr.bf16.mxu1 %v1136_v15 }
  0x3d   :  { %1002 = vmatprep.subr.bf16.mxu0 %v1127_v9 }
  0x3f   :  { %1021 = vmatpush3.bf16.msra.mxu1 %v1136_v15 }
  0x40   :  { %1003 = vmatpush3.bf16.msra.mxu0 %v1127_v9  ;;  %1022 = vmatprep.subr.bf16.mxu1 %v1137_v16 }
  0x41   :  { %1004 = vmatprep.subr.bf16.mxu0 %v1128_v10 }
  0x43   :  { %1023 = vmatpush3.bf16.msra.mxu1 %v1137_v16 }
  0x44   :  { %1005 = vmatpush3.bf16.msra.mxu0 %v1128_v10  ;;  %1024 = vmatprep.subr.bf16.mxu1 %v1138_v17 }
  0x45   :  { %1030 = vmatprep.subr.bf16.mxu0 %v1139_v18 }
  0x47   :  { %1007 = vmatmul.mubr.bf16.vlgmr.msra.gmra.mrb[0].mxu0 %v1130_v11  ;;  %1025 = vmatpush3.bf16.msra.mxu1 %v1138_v17 }
  0x48   :  { %1031 = vmatpush3.bf16.msra.mxu0 %v1139_v18  ;;  %1050 = vmatprep.subr.bf16.mxu1 %v1147_v57 }
  0x49   :  { %1032 = vmatprep.subr.bf16.mxu0 %v1140_v19 }
  0x4c   :  { %1033 = vmatpush3.bf16.msra.mxu0 %v1140_v19 }
  0x4d   :  { %1034 = vmatprep.subr.bf16.mxu0 %v1141_v51 }
  0x50   :  { %1035 = vmatpush3.bf16.msra.mxu0 %v1141_v51 }
  0x51   :  { %1036 = vmatprep.subr.bf16.mxu0 %v1142_v52 }
  0x54   :  { %1037 = vmatpush3.bf16.msra.mxu0 %v1142_v52 }
  0x55   :  { %1038 = vmatprep.subr.bf16.mxu0 %v1143_v53 }
  0x58   :  { %1039 = vmatpush3.bf16.msra.mxu0 %v1143_v53 }
  0x59   :  { %1040 = vmatprep.subr.bf16.mxu0 %v1144_v54 }
  0x5c   :  { %1041 = vmatpush3.bf16.msra.mxu0 %v1144_v54 }
  0x5d   :  { %1042 = vmatprep.subr.bf16.mxu0 %v1145_v55 }
  0x60   :  { %1043 = vmatpush3.bf16.msra.mxu0 %v1145_v55 }
  0x61   :  { %1044 = vmatprep.subr.bf16.mxu0 %v1146_v56 }
  0x64   :  { %1045 = vmatpush3.bf16.msra.mxu0 %v1146_v56 }
 0x11a   :  { %v1008_v21 = vpop.f32.mrb[0].mxu0 }
 0x11b   :  { %v195_v22 = vadd.f32 %v1008_v21, %v876_v20  ;;  %v186_v23 = vpop.f32.mrb[1].mxu0 }
 0x11c   :  { %v187_v24 = vadd.f32 %v876_v20, %v186_v23  ;;  %v1009_v25 = vpop.f32.mrb[2].mxu0 }
 0x11d   :  { %v207_v26 = vmul.f32 0.70710677, %v195_v22  ;;  %v198_v27 = vadd.f32 %v1009_v25, %v876_v20  ;;  %v189_v28 = vpop.f32.mrb[3].mxu0  ;;  %v203_v39 = vmul.f32 0.5, %v195_v22 }
 0x11e   :  { %v205_v29 = vmul.f32 0.70710677, %v187_v24  ;;  %v190_v30 = vadd.f32 %v876_v20, %v189_v28  ;;  %v201_v42 = vmul.f32 0.5, %v187_v24  ;;  %v1151_v28 = vld [vmem:[#allocation5 + $0x20] sm:$0xff]  }
 0x11f   :  { %1155 = verf.f32 %v207_v26  ;;  %v208_v31 = vmul.f32 0.70710677, %v198_v27  ;;  %v204_v40 = vmul.f32 0.5, %v198_v27  ;;  %v1149_v26 = vld [vmem:[#allocation5 + $0x10] sm:$0xff]   ;;  %v1150_v27 = vld [vmem:[#allocation5 + $0x18] sm:$0xff]  }
 0x120   :  { %1157 = verf.f32 %v205_v29  ;;  %v206_v32 = vmul.f32 0.70710677, %v190_v30  ;;  %v202_v43 = vmul.f32 0.5, %v190_v30  ;;  %v1152_v29 = vld [vmem:[#allocation5 + $0x28] sm:$0xff]   ;;  %v1153_v30 = vld [vmem:[#allocation5 + $0x30] sm:$0xff]  }
 0x121   :  { %1159 = verf.f32 %v208_v31  ;;  %v1154_v31 = vld [vmem:[#allocation5 + $0x38] sm:$0xff]  }
 0x122   :  { %1161 = verf.f32 %v206_v32  ;;  %v896_v32 = vld [vmem:[%s1485_s6] ss:$0 sm:$0xff] }
 0x129   :  { %v1156_v33 = vpop.eup %1155 }
 0x12a   :  { %v1158_v34 = vpop.eup %1157  ;;  %v215_v35 = vadd.f32 1.0, %v1156_v33 }
 0x12b   :  { %v1160_v36 = vpop.eup %1159  ;;  %v213_v37 = vadd.f32 1.0, %v1158_v34 }
 0x12c   :  { %v1162_v38 = vpop.eup %1161  ;;  %v216_v41 = vadd.f32 1.0, %v1160_v36  ;;  %v219_v45 = vmul.f32 %v215_v35, %v203_v39 }
 0x12d   :  { %v214_v44 = vadd.f32 1.0, %v1162_v38  ;;  %v217_v47 = vmul.f32 %v213_v37, %v201_v42 }
 0x12e   :  { %v220_v46 = vmul.f32 %v216_v41, %v204_v40 }
 0x12f   :  { %v218_v48 = vmul.f32 %v214_v44, %v202_v43 }
 0x130   :  { %v222_v49 = vpack.c.bf16 %v220_v46, %v219_v45 }
 0x131   :  { %v221_v50 = vpack.c.bf16 %v218_v48, %v217_v47 }
 0x133   :  { %1026 = vmatprep.mubr.bf16.mxu1 %v221_v50 }
 0x134   :  { %1027 = vmatmul.mubr.bf16.vlgmr.msra.gmra.mrb[0].mxu1 %v222_v49 }
 0x135   :  { %1051 = vmatpush3.bf16.msra.mxu1 %v1147_v57 }
 0x136   :  { %1052 = vmatprep.subr.bf16.mxu1 %v1148_v58 }
 0x139   :  { %1053 = vmatpush3.bf16.msra.mxu1 %v1148_v58 }
 0x13a   :  { %1054 = vmatprep.subr.bf16.mxu1 %v1149_v26 }
 0x13d   :  { %1055 = vmatpush3.bf16.msra.mxu1 %v1149_v26 }
 0x13e   :  { %1056 = vmatprep.subr.bf16.mxu1 %v1150_v27 }
 0x141   :  { %1057 = vmatpush3.bf16.msra.mxu1 %v1150_v27 }
 0x142   :  { %1058 = vmatprep.subr.bf16.mxu1 %v1151_v28 }
 0x145   :  { %1059 = vmatpush3.bf16.msra.mxu1 %v1151_v28 }
 0x146   :  { %1060 = vmatprep.subr.bf16.mxu1 %v1152_v29 }
 0x149   :  { %1061 = vmatpush3.bf16.msra.mxu1 %v1152_v29 }
 0x14a   :  { %1062 = vmatprep.subr.bf16.mxu1 %v1153_v30 }
 0x14d   :  { %1063 = vmatpush3.bf16.msra.mxu1 %v1153_v30 }
 0x14e   :  { %1064 = vmatprep.subr.bf16.mxu1 %v1154_v31 }
 0x151   :  { %1065 = vmatpush3.bf16.msra.mxu1 %v1154_v31 }
 0x207   :  { %v1028_v60 = vpop.f32.mrb[0].mxu1 }
 0x208   :  { %v337_v61 = vadd.f32 %v1028_v60, %v887_v59  ;;  %v328_v62 = vpop.f32.mrb[1].mxu1 }
 0x209   :  { %v329_v63 = vadd.f32 %v887_v59, %v328_v62  ;;  %v1029_v0 = vpop.f32.mrb[2].mxu1 }
 0x20a   :  { %v349_v1 = vmul.f32 0.70710677, %v337_v61  ;;  %v340_v2 = vadd.f32 %v1029_v0, %v887_v59  ;;  %v331_v3 = vpop.f32.mrb[3].mxu1  ;;  %v345_v14 = vmul.f32 0.5, %v337_v61  ;;  %v635_v0 = vld [vmem:[%s1488_s9 + $0x40] sm:$0xff] }
 0x20b   :  { %v347_v4 = vmul.f32 0.70710677, %v329_v63  ;;  %v332_v5 = vadd.f32 %v887_v59, %v331_v3  ;;  %v343_v17 = vmul.f32 0.5, %v329_v63  ;;  %v627_v63 = vld [vmem:[%s1488_s9] sm:$0xff] }
 0x20c   :  { %1163 = verf.f32 %v349_v1  ;;  %v350_v6 = vmul.f32 0.70710677, %v340_v2  ;;  %v346_v15 = vmul.f32 0.5, %v340_v2  ;;  %v905_v1 = vld [vmem:[%s1487_s8] ss:$0 sm:$0xff] }
 0x20d   :  { %1165 = verf.f32 %v347_v4  ;;  %v348_v7 = vmul.f32 0.70710677, %v332_v5  ;;  %v344_v18 = vmul.f32 0.5, %v332_v5 }
 0x20e   :  { %1167 = verf.f32 %v350_v6 }
 0x20f   :  { %1169 = verf.f32 %v348_v7 }
 0x216   :  { %v1164_v8 = vpop.eup %1163 }
 0x217   :  { %v1166_v9 = vpop.eup %1165  ;;  %v357_v10 = vadd.f32 1.0, %v1164_v8 }
 0x218   :  { %v1168_v11 = vpop.eup %1167  ;;  %v355_v12 = vadd.f32 1.0, %v1166_v9 }
 0x219   :  { %v1170_v13 = vpop.eup %1169  ;;  %v358_v16 = vadd.f32 1.0, %v1168_v11  ;;  %v361_v20 = vmul.f32 %v357_v10, %v345_v14  ;;  %v629_v14 = vld [vmem:[%s1488_s9 + $0x10] sm:$0xff] }
 0x21a   :  { %v356_v19 = vadd.f32 1.0, %v1170_v13  ;;  %v359_v22 = vmul.f32 %v355_v12, %v343_v17  ;;  %v628_v12 = vld [vmem:[%s1488_s9 + $0x8] sm:$0xff]  ;;  %v638_v17 = vld [vmem:[%s1488_s9 + $0x58] sm:$0xff] }
 0x21b   :  { %v362_v21 = vmul.f32 %v358_v16, %v346_v15  ;;  %v636_v13 = vld [vmem:[%s1488_s9 + $0x48] sm:$0xff]  ;;  %v637_v15 = vld [vmem:[%s1488_s9 + $0x50] sm:$0xff]  ;;  %v630_v16 = vld [vmem:[%s1488_s9 + $0x18] sm:$0xff] }
 0x21c   :  { %v360_v23 = vmul.f32 %v356_v19, %v344_v18  ;;  %v631_v18 = vld [vmem:[%s1488_s9 + $0x20] sm:$0xff] }
 0x21d   :  { %v364_v24 = vpack.c.bf16 %v362_v21, %v361_v20  ;;  %v639_v19 = vld [vmem:[%s1488_s9 + $0x60] sm:$0xff]  ;;  %v632_v20 = vld [vmem:[%s1488_s9 + $0x28] sm:$0xff] }
 0x21e   :  { %v363_v25 = vpack.c.bf16 %v360_v23, %v359_v22  ;;  %v640_v21 = vld [vmem:[%s1488_s9 + $0x68] sm:$0xff]  ;;  %v633_v22 = vld [vmem:[%s1488_s9 + $0x30] sm:$0xff] }
 0x21f   :  { %v641_v23 = vld [vmem:[%s1488_s9 + $0x70] sm:$0xff] }
 0x220   :  { %1046 = vmatprep.mubr.bf16.mxu0 %v363_v25  ;;  %v642_v25 = vld [vmem:[%s1488_s9 + $0x78] sm:$0xff] }
 0x221   :  { %1047 = vmatmul.mubr.bf16.vlgmr.msra.gmra.mrb[4].mxu0 %v364_v24  ;;  %v634_v24 = vld [vmem:[%s1488_s9 + $0x38] sm:$0xff]  ;;  %s1255_s9 = smov [#allocation7]  }
 0x222   :  { %1078 = vmatprep.mubr.msk.f32.mxu0 %vm643_vm0, %v627_v63  ;;  %s863_s17 = sshll.u32 %s1255_s9, 4  ;;  %s864_s17 = int_to_ptr.vmem [resolvable:$true] %s863_s17 }
 0x223   :  { %s1223_s8 = scalar_lea.vmem %s864_s17, 2560  ;;  %p1228_p3 = scmp.lt.s32.totalorder %s864_s17, %s864_s17 }
 0x224   :  { %p1224_p2 = scmp.ne.s32.totalorder %s864_s17, %s1223_s8  ;;  %p1229_p4 = scmp.lt.s32.totalorder %s1223_s8, %s1223_s8 }
 0x226   :  { %p1230_p5 = por %p1229_p4, %p1228_p3 }
 0x228   :  { %p1231_p6 = pnand %p1230_p5, %p1224_p2 }
 0x2f4   :  { %v1048_v33 = vpop.f32.mrb[4].mxu0 }
 0x2f5   :  { %v479_v34 = vadd.f32 %v1048_v33, %v896_v32  ;;  %v470_v35 = vpop.f32.mrb[5].mxu0 }
 0x2f6   :  { %v471_v36 = vadd.f32 %v896_v32, %v470_v35  ;;  %v1049_v37 = vpop.f32.mrb[6].mxu0 }
 0x2f7   :  { %v491_v38 = vmul.f32 0.70710677, %v479_v34  ;;  %v482_v39 = vadd.f32 %v1049_v37, %v896_v32  ;;  %v473_v40 = vpop.f32.mrb[7].mxu0  ;;  %v487_v51 = vmul.f32 0.5, %v479_v34 }
 0x2f8   :  { %v489_v41 = vmul.f32 0.70710677, %v471_v36  ;;  %v474_v42 = vadd.f32 %v896_v32, %v473_v40  ;;  %v485_v54 = vmul.f32 0.5, %v471_v36 }
 0x2f9   :  { %1171 = verf.f32 %v491_v38  ;;  %v492_v43 = vmul.f32 0.70710677, %v482_v39  ;;  %v488_v52 = vmul.f32 0.5, %v482_v39 }
 0x2fa   :  { %1173 = verf.f32 %v489_v41  ;;  %v490_v44 = vmul.f32 0.70710677, %v474_v42  ;;  %v486_v55 = vmul.f32 0.5, %v474_v42 }
 0x2fb   :  { %1175 = verf.f32 %v492_v43 }
 0x2fc   :  { %1177 = verf.f32 %v490_v44 }
 0x303   :  { %v1172_v45 = vpop.eup %1171 }
 0x304   :  { %v1174_v46 = vpop.eup %1173  ;;  %v499_v47 = vadd.f32 1.0, %v1172_v45 }
 0x305   :  { %v1176_v48 = vpop.eup %1175  ;;  %v497_v49 = vadd.f32 1.0, %v1174_v46 }
 0x306   :  { %v1178_v50 = vpop.eup %1177  ;;  %v500_v53 = vadd.f32 1.0, %v1176_v48  ;;  %v503_v57 = vmul.f32 %v499_v47, %v487_v51 }
 0x307   :  { %v498_v56 = vadd.f32 1.0, %v1178_v50  ;;  %v501_v59 = vmul.f32 %v497_v49, %v485_v54 }
 0x308   :  { %v504_v58 = vmul.f32 %v500_v53, %v488_v52 }
 0x309   :  { %v502_v60 = vmul.f32 %v498_v56, %v486_v55 }
 0x30a   :  { %v506_v61 = vpack.c.bf16 %v504_v58, %v503_v57 }
 0x30b   :  { %v505_v62 = vpack.c.bf16 %v502_v60, %v501_v59 }
 0x30d   :  { %1066 = vmatprep.mubr.bf16.mxu1 %v505_v62 }
 0x30e   :  { %1067 = vmatmul.mubr.bf16.vlgmr.msra.gmra.mrb[4].mxu1 %v506_v61 }
 0x30f   :  { %1090 = vmatprep.mubr.msk.f32.mxu1 %vm643_vm0, %v635_v0 }
 0x3e1   :  { %v1068_v2 = vpop.f32.mrb[4].mxu1 }
 0x3e2   :  { %v621_v3 = vadd.f32 %v1068_v2, %v905_v1  ;;  %v612_v4 = vpop.f32.mrb[5].mxu1 }
 0x3e3   :  { %v613_v5 = vadd.f32 %v905_v1, %v612_v4  ;;  %v1069_v6 = vpop.f32.mrb[6].mxu1 }
 0x3e4   :  { %839 = vst [vmem:[#allocation7 + $0x50] sm:$0xff] %v621_v3  ;;  %v624_v7 = vadd.f32 %v1069_v6, %v905_v1  ;;  %v615_v8 = vpop.f32.mrb[7].mxu1 }
 0x3e5   :  { %837 = vst [vmem:[#allocation7] sm:$0xff] %v613_v5  ;;  %v616_v9 = vadd.f32 %v905_v1, %v615_v8 }
 0x3e6   :  { %v1106_v10 = vpack.c.bf16 %v624_v7, %v621_v3  ;;  %840 = vst [vmem:[#allocation7 + $0x58] sm:$0xff] %v624_v7 }
 0x3e7   :  { %v1102_v11 = vpack.c.bf16 %v616_v9, %v613_v5  ;;  %838 = vst [vmem:[#allocation7 + $0x8] sm:$0xff] %v616_v9 }
 0x3e9   :  { %1103 = vmatprep.subr.bf16.mxu0 %v1102_v11  ;;  %1110 = vmatprep.subr.bf16.mxu1 %v1102_v11 }
 0x3ea   :  { %1105 = vmatpush3.bf16.msra.mxu0 %v1102_v11  ;;  %1112 = vmatpush3.bf16.msra.mxu1 %v1102_v11 }
 0x3eb   :  { %1107 = vmatprep.subr.bf16.mxu0 %v1106_v10  ;;  %1111 = vmatprep.subr.bf16.mxu1 %v1106_v10 }
 0x3ee   :  { %1109 = vmatpush3.bf16.msra.mxu0 %v1106_v10  ;;  %1113 = vmatpush3.bf16.msra.mxu1 %v1106_v10 }
 0x3f1   :  { %1079 = vmatmul.mubr.msk.f32.vlgmr.msra.gmra.mrb[8].mxu0 %vm643_vm0, %v628_v12  ;;  %1091 = vmatmul.mubr.msk.f32.vlgmr.msra.gmra.mrb[8].mxu1 %vm643_vm0, %v636_v13 }
 0x3f2   :  { %1081 = vmatprep.mubr.msk.f32.mxu0 %vm643_vm0, %v629_v14  ;;  %1093 = vmatprep.mubr.msk.f32.mxu1 %vm643_vm0, %v637_v15 }
 0x3f5   :  { %1082 = vmatmul.mubr.msk.f32.gmra.mrb[10].mxu0 %vm643_vm0, %v630_v16  ;;  %1094 = vmatmul.mubr.msk.f32.gmra.mrb[10].mxu1 %vm643_vm0, %v638_v17 }
 0x3f6   :  { %1084 = vmatprep.mubr.msk.f32.mxu0 %vm643_vm0, %v631_v18  ;;  %1096 = vmatprep.mubr.msk.f32.mxu1 %vm643_vm0, %v639_v19 }
 0x3f9   :  { %1085 = vmatmul.mubr.msk.f32.gmra.mrb[12].mxu0 %vm643_vm0, %v632_v20  ;;  %1097 = vmatmul.mubr.msk.f32.gmra.mrb[12].mxu1 %vm643_vm0, %v640_v21 }
 0x3fa   :  { %1087 = vmatprep.mubr.msk.f32.mxu0 %vm643_vm0, %v633_v22  ;;  %1099 = vmatprep.mubr.msk.f32.mxu1 %vm643_vm0, %v641_v23 }
 0x3fd   :  { %1088 = vmatmul.mubr.msk.f32.gmra.mrb[14].mxu0 %vm643_vm0, %v634_v24  ;;  %1100 = vmatmul.mubr.msk.f32.gmra.mrb[14].mxu1 %vm643_vm0, %v642_v25 }
 0x4c4   :  { %v1080_v26 = vpop.f32.mrb[8].mxu0  ;;  %v1092_v27 = vpop.f32.mrb[8].mxu1 }
 0x4c5   :  { %843 = vst [vmem:[#allocation7 + $0x18] sm:$0xff] %v1080_v26  ;;  %851 = vst [vmem:[#allocation7 + $0x68] sm:$0xff] %v1092_v27  ;;  %v758_v28 = vpop.f32.mrb[9].mxu0  ;;  %v798_v29 = vpop.f32.mrb[9].mxu1 }
 0x4c6   :  { %842 = vst [vmem:[#allocation7 + $0x10] sm:$0xff] %v758_v28  ;;  %850 = vst [vmem:[#allocation7 + $0x60] sm:$0xff] %v798_v29 }
 0x4c8   :  { %v1083_v30 = vpop.f32.mrb[10].mxu0  ;;  %v1095_v31 = vpop.f32.mrb[10].mxu1 }
 0x4c9   :  { %845 = vst [vmem:[#allocation7 + $0x28] sm:$0xff] %v1083_v30  ;;  %853 = vst [vmem:[#allocation7 + $0x78] sm:$0xff] %v1095_v31  ;;  %v768_v32 = vpop.f32.mrb[11].mxu0  ;;  %v808_v33 = vpop.f32.mrb[11].mxu1 }
 0x4ca   :  { %844 = vst [vmem:[#allocation7 + $0x20] sm:$0xff] %v768_v32  ;;  %852 = vst [vmem:[#allocation7 + $0x70] sm:$0xff] %v808_v33 }
 0x4cc   :  { %v1086_v34 = vpop.f32.mrb[12].mxu0  ;;  %v1098_v35 = vpop.f32.mrb[12].mxu1 }
 0x4cd   :  { %847 = vst [vmem:[#allocation7 + $0x38] sm:$0xff] %v1086_v34  ;;  %855 = vst [vmem:[#allocation7 + $0x88] sm:$0xff] %v1098_v35  ;;  %v778_v36 = vpop.f32.mrb[13].mxu0  ;;  %v818_v37 = vpop.f32.mrb[13].mxu1 }
 0x4ce   :  { %846 = vst [vmem:[#allocation7 + $0x30] sm:$0xff] %v778_v36  ;;  %854 = vst [vmem:[#allocation7 + $0x80] sm:$0xff] %v818_v37 }
 0x4d0   :  { %v1089_v38 = vpop.f32.mrb[14].mxu0  ;;  %v1101_v39 = vpop.f32.mrb[14].mxu1 }
 0x4d1   :  { %849 = vst [vmem:[#allocation7 + $0x48] sm:$0xff] %v1089_v38  ;;  %857 = vst [vmem:[#allocation7 + $0x98] sm:$0xff] %v1101_v39  ;;  %v788_v40 = vpop.f32.mrb[15].mxu0  ;;  %v828_v41 = vpop.f32.mrb[15].mxu1 }
 0x4d2   :  { %848 = vst [vmem:[#allocation7 + $0x40] sm:$0xff] %v788_v40  ;;  %856 = vst [vmem:[#allocation7 + $0x90] sm:$0xff] %v828_v41 }
 0x4d3   :  { %1234 = shalt.err (!%p1231_p6)
}
 0x4d4   :  { %s1235_s18 = scalar_lea.hbm %s1489_s10, 2560 }
 0x4d5   :  { %p1236_p7 = scmp.ne.s32.totalorder %s1489_s10, %s1235_s18  ;;  %p1239_p8 = scmp.lt.u32.totalorder %s1235_s18, %s1489_s10 }
 0x4d7   :  { %p1241_p9 = pnand %p1239_p8, %p1236_p7 }
 0x4d9   :  { %1244 = shalt.err (!%p1241_p9)
}
 0x4da   :  { %s1256_s25 = smov 128   ;;  %s1257_s1 = smov 8  }
 0x4db   :  { %869 = dma.vmem_to_hbm [thread:$0]  %s864_s17, 2560, %s1489_s10, [#allocation4], %s1256_s25, %s1256_s25, %s1257_s1  }
 0x4dc   :  { %1249 = dma.done.wait [#allocation4], 2560  }
 0x4dd   :  { %1250 = vsyncadd [#allocation4], 4294964736 }
 0x4de   :  { %873 = vsyncpa [#allocation3], 1 }
 0x4df   :  { %874 = vsyncpa [#allocation6], 1 }
 0x4e0   :  { %875 = vsyncpa [#allocation4], 1 }

</bundles_post_ra>
